<compile_context>
chip_gen: v7x
topology: tpu7x:2x2x1
jax: 0.10.0
libtpu: 0.0.40
codegen_flags: <defaults>
</compile_context>

<pallas_src>
import functools

import jax
import jax.numpy as jnp
import numpy as np
from jax.experimental import pallas as pl
from jax.experimental.pallas import tpu as pltpu


def latent_encoder_kernel(*refs, batch, n_ctx, h_dim, z_dim, num_hidden, inv_n, out_w):
    """Single-shot: MLP over B*N rows -> in-kernel mean over context -> fused heads -> reparam."""
    if num_hidden > 0:
        (x_ref, y_ref, w_x_ref, w_y_ref, w_h_ref,
         bias_ref, w_head_ref, eps_ref, out_ref) = refs
    else:
        (x_ref, y_ref, w_x_ref, w_y_ref,
         bias_ref, w_head_ref, eps_ref, out_ref) = refs
        w_h_ref = None

    cd = w_x_ref.dtype  # matmul operand dtype (f32 or bf16); accumulation is always f32

    # Input linear, W_in split by rows (x | y) -> no concatenation anywhere.
    h = (jnp.dot(x_ref[...].astype(cd), w_x_ref[...], preferred_element_type=jnp.float32)
         + jnp.dot(y_ref[...].astype(cd), w_y_ref[...], preferred_element_type=jnp.float32)
         + bias_ref[0:1, :h_dim])                                     # (B*N, H), f32

    # (ReLU, Linear(H, H)) * (num_layers - 1)  -- static unroll, tiny trip count.
    for l in range(num_hidden):
        h = jnp.maximum(h, 0.0)
        h = (jnp.dot(h.astype(cd), w_h_ref[l], preferred_element_type=jnp.float32)
             + bias_ref[1 + l:2 + l, :h_dim])

    # aggregation = mean over the context dim: reshape + sublane reduce (XLU),
    # no averaging matrix, no extra input.  (N is a multiple of the sublane tile
    # here, so the reshape is layout-preserving.)
    h3 = h.reshape(batch, n_ctx, h_dim)                               # (B, N, H)
    h_agg = jnp.sum(h3, axis=1) * inv_n                               # (B, H)

    # fused heads: (B, H) @ (H, 2Z); first Z cols = mu, last Z = w.
    heads = (jnp.dot(h_agg.astype(cd), w_head_ref[...], preferred_element_type=jnp.float32)
             + bias_ref[1 + num_hidden:2 + num_hidden, :2 * z_dim])
    z_mu = heads[:, :z_dim]
    z_w = heads[:, z_dim:2 * z_dim]

    # reparameterize (f32 elementwise): sigma = 0.1 + 0.9*sigmoid(w); z = mu + sigma*eps
    z_sigma = 0.1 + 0.9 * jax.nn.sigmoid(z_w)
    z = z_mu + z_sigma * eps_ref[...]

    # Single lane-dense store: [z | mu | sigma | 0-pad] -> (B, out_w), out_w % 128 == 0.
    parts = [z, z_mu, z_sigma]
    pad_cols = out_w - 3 * z_dim
    if pad_cols:
        parts.append(jnp.zeros((batch, pad_cols), jnp.float32))
    out_ref[...] = jnp.concatenate(parts, axis=-1).astype(out_ref.dtype)


def prepare_params(params, x_dim, matmul_dtype=jnp.float32):
    """One-time parameter preparation (NOT per forward call):
    split W_in by rows, fuse the two heads, pack all biases into one lane-dense slab,
    and (optionally) cast the matmul weights to bf16."""
    h_dim = params["w_in"].shape[1]
    z_dim = params["w_mu"].shape[1]
    num_hidden = params["w_h"].shape[0]
    bias_w = max(h_dim, 2 * z_dim)

    def pad_row(b):  # (1, k) -> (1, bias_w)
        return jnp.pad(b, ((0, 0), (0, bias_w - b.shape[-1])))

    rows = [pad_row(params["b_in"])]
    rows += [pad_row(params["b_h"][l]) for l in range(num_hidden)]
    rows.append(pad_row(jnp.concatenate([params["b_mu"], params["b_w"]], axis=-1)))
    bias_slab = jnp.concatenate(rows, axis=0).astype(jnp.float32)      # (num_hidden+2, bias_w)

    md = matmul_dtype
    prepared = {
        "w_x": params["w_in"][:x_dim].astype(md),                      # (x_dim, H)
        "w_y": params["w_in"][x_dim:].astype(md),                      # (y_dim, H)
        "w_head": jnp.concatenate([params["w_mu"], params["w_w"]], axis=1).astype(md),  # (H, 2Z)
        "bias_slab": bias_slab,
        "num_hidden": num_hidden,
    }
    if num_hidden > 0:
        prepared["w_h"] = params["w_h"].astype(md)                     # (num_hidden, H, H)
    return prepared


def latent_encoder_forward(x_context, y_context, x_target, prepared, eps):
    """Pallas wrapper. x_target is accepted for signature fidelity but (as in the
    torch module's forward) is never used."""
    del x_target
    B, N, x_dim = x_context.shape
    y_dim = y_context.shape[-1]
    h_dim = prepared["w_x"].shape[1]
    z_dim = prepared["w_head"].shape[1] // 2
    num_hidden = prepared["num_hidden"]
    out_w = ((3 * z_dim + 127) // 128) * 128                           # lane-dense output width

    # Contiguous reshapes only (bitcast at the XLA level, no HBM materialization).
    x2 = x_context.reshape(B * N, x_dim)
    y2 = y_context.reshape(B * N, y_dim)

    kernel = functools.partial(
        latent_encoder_kernel,
        batch=B, n_ctx=N, h_dim=h_dim, z_dim=z_dim,
        num_hidden=num_hidden, inv_n=1.0 / N, out_w=out_w)

    inputs = [x2, y2, prepared["w_x"], prepared["w_y"]]
    if num_hidden > 0:                      # num_layers == 1 variant drops this input entirely
        inputs.append(prepared["w_h"])
    inputs += [prepared["bias_slab"], prepared["w_head"], eps]

    packed = pl.pallas_call(
        kernel,
        out_shape=jax.ShapeDtypeStruct((B, out_w), jnp.float32),
        # No grid: single invocation, full arrays resident in VMEM, single-buffered.
        in_specs=[pl.BlockSpec(memory_space=pltpu.MemorySpace.VMEM) for _ in inputs],
        out_specs=pl.BlockSpec(memory_space=pltpu.MemorySpace.VMEM),
        compiler_params=pltpu.CompilerParams(vmem_limit_bytes=32 * 1024 * 1024),
    )(*inputs)

    z = packed[:, :z_dim]
    z_mu = packed[:, z_dim:2 * z_dim]
    z_sigma = packed[:, 2 * z_dim:3 * z_dim]
    return z, z_mu, z_sigma


def reference_forward(x_context, y_context, params, eps, num_layers):
    """Pure-JAX reference mirroring the torch module semantics."""
    h = jnp.concatenate([x_context, y_context], axis=-1)
    h = h @ params["w_in"] + params["b_in"][0]
    for l in range(num_layers - 1):
        h = jnp.maximum(h, 0.0)
        h = h @ params["w_h"][l] + params["b_h"][l, 0]
    h = jnp.mean(h, axis=1)                                            # aggregation over dim=1
    z_mu = h @ params["w_mu"] + params["b_mu"][0]
    z_w = h @ params["w_w"] + params["b_w"][0]
    z_sigma = 0.1 + 0.9 * jax.nn.sigmoid(z_w)
    z = z_mu + z_sigma * eps
    return z, z_mu, z_sigma


def init_params(key, x_dim, y_dim, h_dim, z_dim, num_layers):
    din = x_dim + y_dim
    num_hidden = num_layers - 1
    ks = jax.random.split(key, 8)
    scale = 0.1
    return {
        "w_in": scale * jax.random.normal(ks[0], (din, h_dim), jnp.float32),
        "b_in": scale * jax.random.normal(ks[1], (1, h_dim), jnp.float32),
        "w_h": scale * jax.random.normal(ks[2], (num_hidden, h_dim, h_dim), jnp.float32),
        "b_h": scale * jax.random.normal(ks[3], (num_hidden, 1, h_dim), jnp.float32),
        "w_mu": scale * jax.random.normal(ks[4], (h_dim, z_dim), jnp.float32),
        "b_mu": scale * jax.random.normal(ks[5], (1, z_dim), jnp.float32),
        "w_w": scale * jax.random.normal(ks[6], (h_dim, z_dim), jnp.float32),
        "b_w": scale * jax.random.normal(ks[7], (1, z_dim), jnp.float32),
    }


if __name__ == "__main__":
    # Small, module-consistent shapes.
    B, N, N_tgt = 2, 8, 4
    x_dim, y_dim, h_dim, z_dim = 3, 2, 32, 16
    num_layers = 2

    key = jax.random.PRNGKey(0)
    k_x, k_y, k_xt, k_eps, k_p = jax.random.split(key, 5)

    x_context = jax.random.normal(k_x, (B, N, x_dim), jnp.float32)
    y_context = jax.random.normal(k_y, (B, N, y_dim), jnp.float32)
    x_target = jax.random.normal(k_xt, (B, N_tgt, x_dim), jnp.float32)  # unused by forward
    # TODO(synk): torch.randn_like noise has no bitwise Pallas equivalent; drawn here with JAX PRNG.
    eps = jax.random.normal(k_eps, (B, z_dim), jnp.float32)             # reparameterization noise

    params = init_params(k_p, x_dim, y_dim, h_dim, z_dim, num_layers)
    z_ref, z_mu_ref, z_sigma_ref = reference_forward(
        x_context, y_context, params, eps, num_layers)

    # --- f32 matmul path (tight tolerance) ---
    prepared_f32 = prepare_params(params, x_dim, matmul_dtype=jnp.float32)
    z, z_mu, z_sigma = latent_encoder_forward(
        x_context, y_context, x_target, prepared_f32, eps)
    jax.block_until_ready((z, z_mu, z_sigma))
    np.testing.assert_allclose(np.asarray(z), np.asarray(z_ref), rtol=1e-5, atol=1e-5)
    np.testing.assert_allclose(np.asarray(z_mu), np.asarray(z_mu_ref), rtol=1e-5, atol=1e-5)
    np.testing.assert_allclose(np.asarray(z_sigma), np.asarray(z_sigma_ref), rtol=1e-5, atol=1e-5)

    # --- bf16 matmul-operand path (v6e/v7x MXU feeds; f32 accumulation + f32 reparam) ---
    prepared_bf16 = prepare_params(params, x_dim, matmul_dtype=jnp.bfloat16)
    z_b, z_mu_b, z_sigma_b = latent_encoder_forward(
        x_context, y_context, x_target, prepared_bf16, eps)
    jax.block_until_ready((z_b, z_mu_b, z_sigma_b))
    np.testing.assert_allclose(np.asarray(z_b), np.asarray(z_ref), rtol=2e-2, atol=2e-2)
    np.testing.assert_allclose(np.asarray(z_mu_b), np.asarray(z_mu_ref), rtol=2e-2, atol=2e-2)
    np.testing.assert_allclose(np.asarray(z_sigma_b), np.asarray(z_sigma_ref), rtol=2e-2, atol=2e-2)

    print("KERNEL_OK")
</pallas_src>

<mosaic_0001>
module attributes {stable_mosaic.version = 11 : i64} {
  func.func @latent_encoder_kernel(%arg0: memref<16x3xf32, #tpu.memory_space<vmem>>, %arg1: memref<16x2xf32, #tpu.memory_space<vmem>>, %arg2: memref<3x32xf32, #tpu.memory_space<vmem>>, %arg3: memref<2x32xf32, #tpu.memory_space<vmem>>, %arg4: memref<1x32x32xf32, #tpu.memory_space<vmem>>, %arg5: memref<3x32xf32, #tpu.memory_space<vmem>>, %arg6: memref<32x32xf32, #tpu.memory_space<vmem>>, %arg7: memref<2x16xf32, #tpu.memory_space<vmem>>, %arg8: memref<2x128xf32, #tpu.memory_space<vmem>>) attributes {dimension_semantics = [], scalar_prefetch = 0 : i64, scratch_operands = 0 : i64, tpu.core_type = #tpu.core_type<tc>} {
    %c0 = arith.constant 0 : index
    %c0_0 = arith.constant 0 : index
    %0 = vector.load %arg0[%c0, %c0_0] : memref<16x3xf32, #tpu.memory_space<vmem>>, vector<16x3xf32>
    %c0_1 = arith.constant 0 : index
    %c0_2 = arith.constant 0 : index
    %1 = vector.load %arg2[%c0_1, %c0_2] : memref<3x32xf32, #tpu.memory_space<vmem>>, vector<3x32xf32>
    %cst = arith.constant dense<0.000000e+00> : vector<16x32xf32>
    %2 = tpu.matmul %0, %1, %cst {dimension_numbers = #tpu.dot_dimension_numbers<[1], [0], [0], [1], [0, 0, 1, 1], [], []>} : vector<16x3xf32>, vector<3x32xf32>, vector<16x32xf32> -> vector<16x32xf32>
    %c0_3 = arith.constant 0 : index
    %c0_4 = arith.constant 0 : index
    %3 = vector.load %arg1[%c0_3, %c0_4] : memref<16x2xf32, #tpu.memory_space<vmem>>, vector<16x2xf32>
    %c0_5 = arith.constant 0 : index
    %c0_6 = arith.constant 0 : index
    %4 = vector.load %arg3[%c0_5, %c0_6] : memref<2x32xf32, #tpu.memory_space<vmem>>, vector<2x32xf32>
    %cst_7 = arith.constant dense<0.000000e+00> : vector<16x32xf32>
    %5 = tpu.matmul %3, %4, %cst_7 {dimension_numbers = #tpu.dot_dimension_numbers<[1], [0], [0], [1], [0, 0, 1, 1], [], []>} : vector<16x2xf32>, vector<2x32xf32>, vector<16x32xf32> -> vector<16x32xf32>
    %6 = arith.addf %2, %5 : vector<16x32xf32>
    %c0_8 = arith.constant 0 : index
    %c0_9 = arith.constant 0 : index
    %7 = vector.load %arg5[%c0_8, %c0_9] : memref<3x32xf32, #tpu.memory_space<vmem>>, vector<1x32xf32>
    %8 = vector.broadcast %7 : vector<1x32xf32> to vector<16x32xf32>
    %9 = arith.addf %6, %8 : vector<16x32xf32>
    %cst_10 = arith.constant 0.000000e+00 : f32
    %10 = vector.broadcast %cst_10 : f32 to vector<16x32xf32>
    %11 = arith.maximumf %9, %10 : vector<16x32xf32>
    %c0_11 = arith.constant 0 : index
    %c0_12 = arith.constant 0 : index
    %c0_13 = arith.constant 0 : index
    %12 = vector.load %arg4[%c0_11, %c0_12, %c0_13] : memref<1x32x32xf32, #tpu.memory_space<vmem>>, vector<1x32x32xf32>
    %13 = vector.shape_cast %12 : vector<1x32x32xf32> to vector<32x32xf32>
    %cst_14 = arith.constant dense<0.000000e+00> : vector<16x32xf32>
    %14 = tpu.matmul %11, %13, %cst_14 {dimension_numbers = #tpu.dot_dimension_numbers<[1], [0], [0], [1], [0, 0, 1, 1], [], []>} : vector<16x32xf32>, vector<32x32xf32>, vector<16x32xf32> -> vector<16x32xf32>
    %c1 = arith.constant 1 : index
    %c0_15 = arith.constant 0 : index
    %15 = vector.load %arg5[%c1, %c0_15] : memref<3x32xf32, #tpu.memory_space<vmem>>, vector<1x32xf32>
    %16 = vector.broadcast %15 : vector<1x32xf32> to vector<16x32xf32>
    %17 = arith.addf %14, %16 : vector<16x32xf32>
    %18 = vector.shape_cast %17 : vector<16x32xf32> to vector<2x8x32xf32>
    %cst_16 = arith.constant dense<0.000000e+00> : vector<2x32xf32>
    %19 = vector.multi_reduction <add>, %18, %cst_16 [1] : vector<2x8x32xf32> to vector<2x32xf32>
    %cst_17 = arith.constant 1.250000e-01 : f32
    %20 = vector.broadcast %cst_17 : f32 to vector<2x32xf32>
    %21 = arith.mulf %19, %20 : vector<2x32xf32>
    %c0_18 = arith.constant 0 : index
    %c0_19 = arith.constant 0 : index
    %22 = vector.load %arg6[%c0_18, %c0_19] : memref<32x32xf32, #tpu.memory_space<vmem>>, vector<32x32xf32>
    %cst_20 = arith.constant dense<0.000000e+00> : vector<2x32xf32>
    %23 = tpu.matmul %21, %22, %cst_20 {dimension_numbers = #tpu.dot_dimension_numbers<[1], [0], [0], [1], [0, 0, 1, 1], [], []>} : vector<2x32xf32>, vector<32x32xf32>, vector<2x32xf32> -> vector<2x32xf32>
    %c2 = arith.constant 2 : index
    %c0_21 = arith.constant 0 : index
    %24 = vector.load %arg5[%c2, %c0_21] : memref<3x32xf32, #tpu.memory_space<vmem>>, vector<1x32xf32>
    %25 = vector.broadcast %24 : vector<1x32xf32> to vector<2x32xf32>
    %26 = arith.addf %23, %25 : vector<2x32xf32>
    %27 = vector.extract_strided_slice %26 {offsets = [0, 0], sizes = [2, 16], strides = [1, 1]} : vector<2x32xf32> to vector<2x16xf32>
    %28 = vector.extract_strided_slice %26 {offsets = [0, 16], sizes = [2, 16], strides = [1, 1]} : vector<2x32xf32> to vector<2x16xf32>
    %29 = arith.negf %28 : vector<2x16xf32>
    %30 = math.exp %29 : vector<2x16xf32>
    %cst_22 = arith.constant 1.000000e+00 : f32
    %31 = vector.broadcast %cst_22 : f32 to vector<2x16xf32>
    %32 = arith.addf %31, %30 : vector<2x16xf32>
    %33 = arith.divf %31, %32 : vector<2x16xf32>
    %cst_23 = arith.constant 0.899999976 : f32
    %34 = vector.broadcast %cst_23 : f32 to vector<2x16xf32>
    %35 = arith.mulf %34, %33 : vector<2x16xf32>
    %cst_24 = arith.constant 1.000000e-01 : f32
    %36 = vector.broadcast %cst_24 : f32 to vector<2x16xf32>
    %37 = arith.addf %36, %35 : vector<2x16xf32>
    %c0_25 = arith.constant 0 : index
    %c0_26 = arith.constant 0 : index
    %38 = vector.load %arg7[%c0_25, %c0_26] : memref<2x16xf32, #tpu.memory_space<vmem>>, vector<2x16xf32>
    %39 = arith.mulf %37, %38 : vector<2x16xf32>
    %40 = arith.addf %27, %39 : vector<2x16xf32>
    %cst_27 = arith.constant 0.000000e+00 : f32
    %41 = vector.broadcast %cst_27 : f32 to vector<2x80xf32>
    %42 = tpu.concatenate %40, %27, %37, %41 in 1 : vector<2x16xf32>, vector<2x16xf32>, vector<2x16xf32>, vector<2x80xf32> -> vector<2x128xf32>
    %c0_28 = arith.constant 0 : index
    %c0_29 = arith.constant 0 : index
    %43 = vector.load %arg8[%c0_28, %c0_29] : memref<2x128xf32, #tpu.memory_space<vmem>>, vector<2x128xf32>
    tpu.vector_store %arg8[%c0_28, %c0_29], %42 {strides = array<i32>} : memref<2x128xf32, #tpu.memory_space<vmem>>, vector<2x128xf32>,
    return
  }
}

</mosaic_0001>

<bundles_post_ra>
// kernel: tpu_custom_call.1
= control target key start
LH: loop header
LB: loop body
LE: loop exit
PB: predicated region body
PF: predicated region fallthrough
CT: control target
= control target key end

     0   :  { %13 = vsyncpa [#allocation3], 0  ;;  %s739_s0 = inlined_call_operand.vmem [shape: f32[16,3], index: 0, kind: input, shape index: {}]   ;;  %s740_s1 = inlined_call_operand.vmem [shape: f32[16,2], index: 1, kind: input, shape index: {}]   ;;  %s741_s2 = inlined_call_operand.vmem [shape: f32[3,32], index: 2, kind: input, shape index: {}]   ;;  %s742_s3 = inlined_call_operand.vmem [shape: f32[2,32], index: 3, kind: input, shape index: {}]   ;;  %s743_s4 = inlined_call_operand.vmem [shape: f32[1,32,32], index: 4, kind: input, shape index: {}]   ;;  %s744_s5 = inlined_call_operand.vmem [shape: f32[3,32], index: 5, kind: input, shape index: {}]   ;;  %s745_s6 = inlined_call_operand.hbm [shape: f32[32,32], index: 6, kind: input, shape index: {}]   ;;  %s746_s7 = inlined_call_operand.vmem [shape: f32[2,16], index: 7, kind: input, shape index: {}]   ;;  %s747_s8 = inlined_call_operand.hbm [shape: f32[2,128], index: 8, kind: output, shape index: {}]  }
   0x1   :  { %14 = vsyncpa [#allocation4], 0  ;;  %s610_s27 = smov [#allocation2]   ;;  %s562_s9 = scalar_lea.hbm %s745_s6, 512 }
   0x2   :  { %s32_s28 = sshll.u32 %s610_s27, 4  ;;  %p563_p0 = scmp.ne.s32.totalorder %s745_s6, %s562_s9  ;;  %s33_s28 = int_to_ptr.vmem [resolvable:$true] %s32_s28 }
   0x3   :  { %p566_p1 = scmp.lt.u32.totalorder %s562_s9, %s745_s6 }
   0x5   :  { %p568_p2 = pnand %p566_p1, %p563_p0 }
   0x7   :  { %571 = shalt.err (!%p568_p2)
}
   0x8   :  { %s572_s14 = scalar_lea.vmem %s33_s28, 512  ;;  %p577_p4 = scmp.lt.s32.totalorder %s33_s28, %s33_s28 }
   0x9   :  { %p573_p3 = scmp.ne.s32.totalorder %s33_s28, %s572_s14  ;;  %p578_p5 = scmp.lt.s32.totalorder %s572_s14, %s572_s14 }
   0xb   :  { %p579_p6 = por %p578_p5, %p577_p4 }
   0xd   :  { %p580_p7 = pnand %p579_p6, %p573_p3 }
   0xf   :  { %583 = shalt.err (!%p580_p7)
}
  0x10   :  { %s611_s15 = smov 128   ;;  %s612_s16 = smov 8  }
  0x11   :  { %38 = dma.hbm_to_vmem [thread:$0]  %s745_s6, 512, %s33_s28, [#allocation3], %s611_s15, %s611_s15, %s612_s16  }
  0x12   :  { %606 = dma.done.wait [#allocation3], 512  }
  0x13   :  { %607 = vsyncadd [#allocation3], 4294966784  ;;  %vm57_vm0 = vcmask 1041408   ;;  %vm143_vm1 = vcmask 1042432   ;;  %vm50_vm2 = vcmask 15360   ;;  %v47_v2 = vld [vmem:[%s740_s1] sm:$0xff] }
  0x14   :  { %v49_v0 = vld [vmem:[%s742_s3] sm:$0x3]  ;;  %vm136_vm3 = vcmask 23552   ;;  %v48_v4 = vld [vmem:[%s740_s1 + $0x8] sm:$0xff]  ;;  %503 = vmatprep.mubr.msk.f32.mxu1 %vm50_vm2, %v47_v2  ;;  %v233_v9 = vld [vmem:[%s743_s4 + $0x10] sm:$0xff]  ;;  %vm240_vm4 = vcmask 261120  }
  0x15   :  { %v46_v1 = vld [vmem:[%s741_s2] sm:$0x7]  ;;  %501 = vmatprep.subr.msk.mxu1 %vm57_vm0, %v49_v0  ;;  %v45_v5 = vld [vmem:[%s739_s0 + $0x8] sm:$0xff]  ;;  %v234_v10 = vld [vmem:[%s743_s4 + $0x18] sm:$0xff]  ;;  %v613_v26 = vmov 0.0|0.0   ;;  %vm614_vm5 = vmmov 0  }
  0x16   :  { %506 = vmatprep.subr.msk.mxu0 %vm143_vm1, %v46_v1  ;;  %v44_v3 = vld [vmem:[%s739_s0] sm:$0xff]  ;;  %502 = vmatpush3.msk.msra.mxu1 %vm57_vm0, %v49_v0  ;;  %v232_v7 = vld [vmem:[%s743_s4 + $0x8] sm:$0xff]  ;;  %v537_v11 = vpack.c.bf16 %v234_v10, %v233_v9  ;;  %v340_v27 = vld [vmem:[#allocation2 + $0x10] sm:$0xff]  ;;  %v615_v30 = vmov 0.0   ;;  %s616_s15 = smov 16   ;;  %vm349_vm6 = vcmask 1041409  }
  0x17   :  { %507 = vmatpush3.msk.msra.mxu0 %vm143_vm1, %v46_v1  ;;  %508 = vmatprep.mubr.msk.f32.mxu0 %vm136_vm3, %v44_v3  ;;  %v231_v6 = vld [vmem:[%s743_s4] sm:$0xff]  ;;  %v339_v24 = vld [vmem:[#allocation2 + $0x8] sm:$0xff]  ;;  %v341_v28 = vld [vmem:[#allocation2 + $0x18] sm:$0xff]  ;;  %s617_s19 = smov 112   ;;  %vm450_vm7 = vcmask 130048   ;;  %vm453_vm8 = vcmask 392192  }
  0x18   :  { %504 = vmatmul.mubr.msk.f32.vlgmr.msra.gmra.mrb[0].mxu1 %vm50_vm2, %v48_v4  ;;  %509 = vmatmul.mubr.msk.f32.vlgmr.msra.gmra.mrb[0].mxu0 %vm136_vm3, %v45_v5  ;;  %v533_v8 = vpack.c.bf16 %v232_v7, %v231_v6  ;;  %v477_v14 = vld [vmem:[%s744_s5] ss:$0 sm:$0xff]  ;;  %v545_v29 = vpack.c.bf16 %v341_v28, %v340_v27  ;;  %v478_v32 = vld [vmem:[%s744_s5 + $0x1] ss:$0 sm:$0xff]  ;;  %v481_v54 = vld [vmem:[%s744_s5 + $0x2] ss:$0 sm:$0xff] }
  0x19   :  { %v338_v23 = vld [vmem:[#allocation2] sm:$0xff]  ;;  %541 = vmatprep.subr.bf16.mxu0 %v613_v26  ;;  %530 = vmatprep.mubr.msk.f32.mxu0 %vm614_vm5, %v615_v30  ;;  %s618_s5 = smov [#allocation5]  }
  0x1a   :  { %534 = vmatprep.subr.bf16.mxu1 %v533_v8  ;;  %v542_v25 = vpack.c.bf16 %v339_v24, %v338_v23  ;;  %v431_v31 = vld [vmem:[%s746_s7] sm:$0x3]  ;;  %s462_s20 = sshll.u32 %s618_s5, 4  ;;  %s463_s20 = int_to_ptr.vmem [resolvable:$true] %s462_s20 }
  0x1b   :  { %536 = vmatpush3.bf16.msra.mxu1 %v533_v8  ;;  %433 = vrot.lane.b32.xlu0 %v431_v31, %s616_s15  ;;  %s584_s21 = scalar_lea.vmem %s463_s20, 32  ;;  %p589_p9 = scmp.lt.s32.totalorder %s463_s20, %s463_s20 }
  0x1c   :  { %538 = vmatprep.subr.bf16.mxu1 %v537_v11  ;;  %543 = vmatpush3.bf16.msra.mxu0 %v542_v25  ;;  %p585_p8 = scmp.ne.s32.totalorder %s463_s20, %s584_s21  ;;  %p590_p10 = scmp.lt.s32.totalorder %s584_s21, %s584_s21 }
  0x1d   :  { %544 = vmatprep.subr.bf16.mxu0 %v613_v26 }
  0x1e   :  { %p591_p11 = por %p590_p10, %p589_p9 }
  0x1f   :  { %540 = vmatpush3.bf16.msra.mxu1 %v537_v11 }
  0x20   :  { %546 = vmatpush3.bf16.msra.mxu0 %v545_v29  ;;  %p592_p12 = pnand %p591_p11, %p585_p8 }
  0x8d   :  { %v434_v63 = vpop.permute.xlu0 %433 }
  0xeb   :  { %v505_v12 = vpop.f32.mrb[0].mxu1  ;;  %v510_v13 = vpop.f32.mrb[0].mxu0 }
  0xec   :  { %v219_v15 = vadd.f32 %v510_v13, %v505_v12  ;;  %v127_v16 = vpop.f32.mrb[1].mxu1  ;;  %v213_v17 = vpop.f32.mrb[1].mxu0 }
  0xed   :  { %v214_v18 = vadd.f32 %v213_v17, %v127_v16 }
  0xee   :  { %v228_v19 = vadd.f32 %v477_v14, %v219_v15 }
  0xef   :  { %v227_v20 = vadd.f32 %v477_v14, %v214_v18 }
  0xf0   :  { %v230_v22 = vmax.f32 %v228_v19, 0.0 }
  0xf1   :  { %v229_v21 = vmax.f32 %v227_v20, 0.0 }
  0xf3   :  { %519 = vmatprep.mubr.msk.f32.mxu1 %vm240_vm4, %v229_v21 }
  0xf4   :  { %520 = vmatmul.mubr.msk.f32.vlgmr.msra.gmra.mrb[2].mxu1 %vm240_vm4, %v230_v22 }
 0x1c7   :  { %v521_v33 = vpop.f32.mrb[2].mxu1 }
 0x1c8   :  { %v319_v34 = vadd.f32 %v521_v33, %v478_v32  ;;  %v313_v35 = vpop.f32.mrb[3].mxu1 }
 0x1c9   :  { %v314_v36 = vadd.f32 %v478_v32, %v313_v35 }
 0x1ca   :  { %v329_v37 = vsel %vm240_vm4, %v319_v34, 0.0 }
 0x1cb   :  { %v330_v38 = vrot.slane %v329_v37, 4  ;;  %v322_v39 = vsel %vm240_vm4, %v314_v36, 0.0 }
 0x1cc   :  { %v323_v40 = vrot.slane %v322_v39, 4 }
 0x1cd   :  { %v331_v41 = vadd.f32 %v330_v38, %v329_v37 }
 0x1ce   :  { %v324_v42 = vadd.f32 %v323_v40, %v322_v39 }
 0x1cf   :  { %v332_v43 = vrot.slane %v331_v41, 2 }
 0x1d0   :  { %v325_v44 = vrot.slane %v324_v42, 2 }
 0x1d1   :  { %v333_v45 = vadd.f32 %v332_v43, %v331_v41 }
 0x1d2   :  { %v326_v46 = vadd.f32 %v325_v44, %v324_v42 }
 0x1d3   :  { %v334_v47 = vrot.slane %v333_v45, 1 }
 0x1d4   :  { %v327_v48 = vrot.slane %v326_v46, 1 }
 0x1d5   :  { %v335_v49 = vadd.f32 %v334_v47, %v333_v45 }
 0x1d6   :  { %v328_v50 = vadd.f32 %v327_v48, %v326_v46 }
 0x1d7   :  { %v337_v51 = vmul.f32 0.125, %v335_v49 }
 0x1d8   :  { %v336_v52 = vmul.f32 0.125, %v328_v50 }
 0x1da   :  { %v350_v53 = vsel %vm349_vm6, %v337_v51, %v336_v52 }
 0x1db   :  { %531 = vmatmul.mubr.msk.f32.vlgmr.msra.gmra.mrb[2].mxu0 %vm240_vm4, %v350_v53 }
 0x2ae   :  { %v419_v55 = vpop.f32.mrb[2].mxu0 }
 0x2af   :  { %v420_v56 = vadd.f32 %v481_v54, %v419_v55  ;;  %v532_v57 = vpop.f32.mrb[3].mxu0 }
 0x2b1   :  { %v483_v58 = vmul.f32 -1.442695, %v420_v56  ;;  %443 = vrot.lane.b32.xlu1 %v420_v56, %s616_s15 }
 0x2b3   :  { %558 = vpow2.f32 %v483_v58 }
 0x2bd   :  { %v559_v59 = vpop.eup %558 }
 0x2be   :  { %v426_v60 = vadd.f32 1.0, %v559_v59 }
 0x2c0   :  { %560 = vrcp.f32 %v426_v60 }
 0x2ca   :  { %v561_v61 = vpop.eup %560 }
 0x2cb   :  { %v429_v62 = vmul.f32 0.9, %v561_v61 }
 0x2cd   :  { %v430_v0 = vadd.f32 0.1, %v429_v62 }
 0x2cf   :  { %v436_v1 = vmul.f32 %v434_v63, %v430_v0  ;;  %447 = vrot.lane.b32.xlu1 %v430_v0, %s616_s15 }
 0x2d1   :  { %438 = vrot.lane.b32.xlu0 %v436_v1, %s617_s19 }
 0x323   :  { %v444_v2 = vpop.permute.xlu1 %443 }
 0x341   :  { %v448_v5 = vpop.permute.xlu1 %447 }
 0x343   :  { %v439_v3 = vpop.permute.xlu0 %438 }
 0x344   :  { %v441_v4 = vadd.f32 %v439_v3, %v420_v56 }
 0x346   :  { %v451_v6 = vsel %vm450_vm7, %v441_v4, %v444_v2 }
 0x347   :  { %v452_v7 = vsel %vm240_vm4, %v451_v6, %v448_v5 }
 0x348   :  { %v454_v8 = vsel %vm453_vm8, %v452_v7, 0.0 }
 0x349   :  { %455 = vst [vmem:[#allocation5] sm:$0x3] %v454_v8 }
 0x34a   :  { %595 = shalt.err (!%p592_p12)
}
 0x34b   :  { %s596_s24 = scalar_lea.hbm %s747_s8, 32 }
 0x34c   :  { %p597_p13 = scmp.ne.s32.totalorder %s747_s8, %s596_s24  ;;  %p600_p0 = scmp.lt.u32.totalorder %s596_s24, %s747_s8 }
 0x34e   :  { %p602_p1 = pnand %p600_p0, %p597_p13 }
 0x350   :  { %605 = shalt.err (!%p602_p1)
}
 0x351   :  { %465 = dma.vmem_to_hbm [thread:$0]  %s463_s20, 32, %s747_s8, [#allocation4]  }
 0x352   :  { %608 = dma.done.wait [#allocation4], 32  }
 0x353   :  { %609 = vsyncadd [#allocation4], 4294967264 }
 0x354   :  { %469 = vsyncpa [#allocation3], 1 }
 0x355   :  { %470 = vsyncpa [#allocation4], 1 }

</bundles_post_ra>
